<compile_context>
chip_gen: v7x
topology: tpu7x:2x2x1
jax: 0.10.0
libtpu: 0.0.40
codegen_flags: <defaults>
</compile_context>

<pallas_src>
import jax
import jax.numpy as jnp
import numpy as np
from jax.experimental import pallas as pl
from jax.experimental.pallas import tpu as pltpu

# ----------------------------- small hyperparams -----------------------------
HP = dict(
    total_items=24,
    item_embed_size=16,
    rnn_size=32,
    hidden_size=32,
    latent_size=8,
)
B, S = 2, 8  # batch, sequence length (max(x_lens) == S, as pack/pad implies)
V_PAD = ((HP["total_items"] + 127) // 128) * 128  # lane-dense decoder out width


# ------------------------------ fused kernel ----------------------------------
def make_fused_svae_kernel(Bsz, S_):
    """Kernel factory; Bsz/S_ are compile-time Python ints (loop is unrolled)."""

    def kernel(x_idx_ref, mask_ref, eps_ref,
               embed_ref, wih_ref, whh_ref, bhhn_ref,
               ew1_ref, eb1_ref, ew2_ref, eb2_ref,
               dw1_ref, db1_ref, dw2_ref, db2_ref,
               dec_ref, zstats_ref):
        # All row-indexed arrays are TIME-MAJOR: row = t * B + b.
        # x_idx_ref: (S*B, 1) int32 item ids
        # mask_ref:  (S*B, 1) fp32, 1.0 iff t < x_lens[b]
        # eps_ref:   (S*B, L) fp32 reparameterization noise
        # embed_ref: (V+1, E); wih_ref: (E, 3R) with r/z biases pre-folded via
        #            a +bias add below; whh_ref: (R, 3R); bhhn_ref: (1, R)
        # e/d w1/w2: pre-transposed Linear weights; dw2/db2 lane-padded to 128
        SB, L = eps_ref.shape
        R = whh_ref.shape[0]
        V1 = embed_ref.shape[0]

        # ---- item embedding lookup as a one-hot matmul (no dynamic gather) ----
        # (ids outside [0, V] map to a zero row; matches valid-input behavior)
        idx = x_idx_ref[...]                                         # (SB, 1)
        iota_v = jax.lax.broadcasted_iota(jnp.int32, (SB, V1), 1)
        onehot = (iota_v == idx).astype(jnp.float32)                 # (SB, V+1)
        x_emb = jnp.dot(onehot, embed_ref[...],
                        preferred_element_type=jnp.float32)          # (SB, E)

        # ---- GRU: input projection hoisted out of the recurrence ----
        # bih already contains b_ih (+ b_hh for the r/z thirds).
        gi_all = jnp.dot(x_emb, wih_ref[...],
                         preferred_element_type=jnp.float32)         # (SB, 3R)
        gi_all = gi_all + dw_bias_placeholder(bhhn_ref, wih_ref) if False else gi_all
        gi_all = gi_all + bih_folded(ew1_ref) if False else gi_all
        return_unused = None  # (never executed branches above; kept out below)

    return kernel


# The factory above got awkward; define the real kernel cleanly instead.
def make_fused_svae_kernel(Bsz, S_):  # noqa: F811  (clean redefinition)
    def kernel(x_idx_ref, mask_ref, eps_ref,
               embed_ref, wih_ref, whh_ref, bih_ref, bhhn_ref,
               ew1_ref, eb1_ref, ew2_ref, eb2_ref,
               dw1_ref, db1_ref, dw2_ref, db2_ref,
               dec_ref, zstats_ref):
        # All row-indexed arrays are TIME-MAJOR: row = t * B + b.
        SB, L = eps_ref.shape
        R = whh_ref.shape[0]
        V1 = embed_ref.shape[0]

        # ---- item embedding lookup as a one-hot matmul (no dynamic gather) ----
        idx = x_idx_ref[...]                                         # (SB, 1)
        iota_v = jax.lax.broadcasted_iota(jnp.int32, (SB, V1), 1)
        onehot = (iota_v == idx).astype(jnp.float32)                 # (SB, V+1)
        x_emb = jnp.dot(onehot, embed_ref[...],
                        preferred_element_type=jnp.float32)          # (SB, E)

        # ---- GRU: input projection hoisted; r/z hidden biases pre-folded ----
        gi_all = jnp.dot(x_emb, wih_ref[...],
                         preferred_element_type=jnp.float32) + bih_ref[...]  # (SB, 3R)

        whh = whh_ref[...]                                           # (R, 3R)
        bhh_n = bhhn_ref[...]                                        # (1, R)

        h = jnp.zeros((Bsz, R), jnp.float32)
        h_hist = []
        for t in range(S_):                                          # unrolled serial path
            gi_t = gi_all[t * Bsz:(t + 1) * Bsz, :]                  # contiguous time-major rows
            gh = jnp.dot(h, whh, preferred_element_type=jnp.float32)  # (B, 3R), no bias
            # fused r/z sigmoid: one EUP pass over 2R lanes
            rz = jax.nn.sigmoid(gi_t[:, :2 * R] + gh[:, :2 * R])
            r = rz[:, :R]
            z = rz[:, R:]
            n = jnp.tanh(gi_t[:, 2 * R:] + r * (gh[:, 2 * R:] + bhh_n))
            h = (1.0 - z) * n + z * h
            h_hist.append(h)                                         # stays in vregs

        # stack once, then mask once (pack_padded/pad_packed: zero rows t >= len)
        rnn_tm = jnp.concatenate(h_hist, axis=0)                     # (SB, R) time-major
        rnn_tm = rnn_tm * mask_ref[...]

        # ---- encoder MLP: R -> Hd -> 2L  (Linear -> tanh -> Linear) ----
        enc_h = jnp.tanh(jnp.dot(rnn_tm, ew1_ref[...],
                                 preferred_element_type=jnp.float32) + eb1_ref[...])
        enc_out = jnp.dot(enc_h, ew2_ref[...],
                          preferred_element_type=jnp.float32) + eb2_ref[...]  # (SB, 2L)

        # ---- reparameterization: z = mu + exp(log_sigma) * eps ----
        mu = enc_out[:, :L]
        log_sigma = enc_out[:, L:]
        z_lat = mu + jnp.exp(log_sigma) * eps_ref[...]

        # ---- decoder MLP: L -> Hd -> V (output lane-padded to 128) ----
        dec_h = jnp.tanh(jnp.dot(z_lat, dw1_ref[...],
                                 preferred_element_type=jnp.float32) + db1_ref[...])
        dec_ref[...] = jnp.dot(dec_h, dw2_ref[...],
                               preferred_element_type=jnp.float32) + db2_ref[...]
        zstats_ref[...] = enc_out                                    # [mu | log_sigma]

    return kernel


def fused_forward_pallas(x_idx_tm, mask_tm, noise_tm, p, *, Bsz, Ssz):
    SB = x_idx_tm.shape[0]
    L = noise_tm.shape[1]
    VP = p["dec_w2_p"].shape[1]
    kernel = make_fused_svae_kernel(Bsz, Ssz)
    return pl.pallas_call(
        kernel,
        out_shape=(
            jax.ShapeDtypeStruct((SB, VP), jnp.float32),      # padded dec_out (time-major)
            jax.ShapeDtypeStruct((SB, 2 * L), jnp.float32),   # [mu | log_sigma] (time-major)
        ),
    )(x_idx_tm, mask_tm, noise_tm,
      p["embed"], p["w_ih_t"], p["w_hh_t"], p["b_ih_folded"], p["b_hh_n"],
      p["enc_w1_t"], p["enc_b1"], p["enc_w2_t"], p["enc_b2"],
      p["dec_w1_t"], p["dec_b1"], p["dec_w2_p"], p["dec_b2_p"])


# ------------------------------ parameter setup -------------------------------
def xavier_normal(key, shape):
    fan_out, fan_in = shape
    std = float(np.sqrt(2.0 / (fan_in + fan_out)))
    return std * jax.random.normal(key, shape, dtype=jnp.float32)


def init_params(key):
    E = HP["item_embed_size"]
    R = HP["rnn_size"]
    Hd = HP["hidden_size"]
    L = HP["latent_size"]
    V = HP["total_items"]
    ks = jax.random.split(key, 12)

    params = {}
    # nn.Embedding(total_items + 1, item_embed_size)  — default N(0,1) init
    params["embed"] = jax.random.normal(ks[0], (V + 1, E), dtype=jnp.float32)

    # nn.GRU(E, R): weights (3R, E) / (3R, R), biases (3R,)
    k = 1.0 / np.sqrt(R)
    params["w_ih"] = jax.random.uniform(ks[1], (3 * R, E), jnp.float32, -k, k)
    params["w_hh"] = jax.random.uniform(ks[2], (3 * R, R), jnp.float32, -k, k)
    params["b_ih"] = jax.random.uniform(ks[3], (3 * R,), jnp.float32, -k, k)
    params["b_hh"] = jax.random.uniform(ks[4], (3 * R,), jnp.float32, -k, k)

    # encoder: (R -> Hd -> 2L), xavier_normal weights
    params["enc_w1"] = xavier_normal(ks[5], (Hd, R))
    params["enc_b1"] = jax.random.uniform(ks[6], (Hd,), jnp.float32,
                                          -1.0 / np.sqrt(R), 1.0 / np.sqrt(R))
    params["enc_w2"] = xavier_normal(ks[7], (2 * L, Hd))
    params["enc_b2"] = jax.random.uniform(ks[8], (2 * L,), jnp.float32,
                                          -1.0 / np.sqrt(Hd), 1.0 / np.sqrt(Hd))

    # decoder: (L -> Hd -> V)
    params["dec_w1"] = xavier_normal(ks[9], (Hd, L))
    params["dec_b1"] = jax.random.uniform(ks[10], (Hd,), jnp.float32,
                                          -1.0 / np.sqrt(L), 1.0 / np.sqrt(L))
    params["dec_w2"] = xavier_normal(ks[11], (V, Hd))
    params["dec_b2"] = jnp.zeros((V,), jnp.float32)
    return params


def prepare_params(params):
    """One-time layout prep: transposes, (1,N) biases, folded GRU r/z biases,
    lane-padded decoder head."""
    V = HP["total_items"]
    R = HP["rnn_size"]

    # Fold hidden-side biases of the r and z gates into the input-side bias.
    # Only the n-gate hidden bias must stay separate: n = tanh(gi_n + r*(gh_n + b_hn)).
    b_ih = params["b_ih"]
    b_hh = params["b_hh"]
    b_ih_folded = jnp.concatenate([b_ih[:2 * R] + b_hh[:2 * R], b_ih[2 * R:]])
    b_hh_n = b_hh[2 * R:]

    dec_w2_t = jnp.transpose(params["dec_w2"])                       # (Hd, V)
    dec_w2_p = jnp.zeros((dec_w2_t.shape[0], V_PAD), jnp.float32)
    dec_w2_p = dec_w2_p.at[:, :V].set(dec_w2_t)
    dec_b2_p = jnp.zeros((1, V_PAD), jnp.float32)
    dec_b2_p = dec_b2_p.at[:, :V].set(params["dec_b2"][None, :])
    return dict(
        embed=params["embed"],
        w_ih_t=jnp.transpose(params["w_ih"]),       # (E, 3R)
        w_hh_t=jnp.transpose(params["w_hh"]),       # (R, 3R)
        b_ih_folded=b_ih_folded.reshape(1, -1),     # (1, 3R)  (b_ih + b_hh[r,z])
        b_hh_n=b_hh_n.reshape(1, -1),               # (1, R)
        enc_w1_t=jnp.transpose(params["enc_w1"]),   # (R, Hd)
        enc_b1=params["enc_b1"].reshape(1, -1),
        enc_w2_t=jnp.transpose(params["enc_w2"]),   # (Hd, 2L)
        enc_b2=params["enc_b2"].reshape(1, -1),
        dec_w1_t=jnp.transpose(params["dec_w1"]),   # (L, Hd)
        dec_b1=params["dec_b1"].reshape(1, -1),
        dec_w2_p=dec_w2_p,                          # (Hd, 128)
        dec_b2_p=dec_b2_p,                          # (1, 128)
    )


# --------------------------------- forward ------------------------------------
@jax.jit
def model_sld_forward(prep, x, x_lens, noise):
    """x: (B, S) int32, x_lens: (B,) int32, noise: (B*S, latent_size) fp32
    (noise given batch-major, matching the reference's row ordering)."""
    Bsz, Ssz = x.shape
    V = HP["total_items"]
    L = HP["latent_size"]

    # ---- time-major reorder (cheap XLA glue on tiny arrays): row = t*B + b ----
    x_tm = jnp.transpose(x.astype(jnp.int32)).reshape(Ssz * Bsz, 1)
    noise_tm = noise.reshape(Bsz, Ssz, L).transpose(1, 0, 2).reshape(Ssz * Bsz, L)
    # pad mask: row (t*B + b) valid iff t < x_lens[b]
    t_iota = jnp.arange(Ssz, dtype=jnp.int32)[:, None]                       # (S, 1)
    mask_tm = (t_iota < x_lens.astype(jnp.int32)[None, :]).astype(jnp.float32)
    mask_tm = mask_tm.reshape(Ssz * Bsz, 1)

    dec_tm, zstats_tm = fused_forward_pallas(x_tm, mask_tm, noise_tm, prep,
                                             Bsz=Bsz, Ssz=Ssz)

    # ---- un-permute back to batch-major, strip the lane padding ----
    dec_out = dec_tm.reshape(Ssz, Bsz, -1)[:, :, :V].transpose(1, 0, 2)      # (B, S, V)
    zstats = zstats_tm.reshape(Ssz, Bsz, 2 * L).transpose(1, 0, 2)
    zstats = zstats.reshape(Bsz * Ssz, 2 * L)
    z_mean = zstats[:, :L]
    z_log_sigma = zstats[:, L:]
    return dec_out, z_mean, z_log_sigma


# ----------------------------------- main --------------------------------------
if __name__ == "__main__":
    key = jax.random.PRNGKey(0)
    k_param, k_x, k_noise = jax.random.split(key, 3)

    params = init_params(k_param)
    prep = prepare_params(params)

    # deterministic inputs; lengths sorted descending with max == S
    x = jax.random.randint(k_x, (B, S), 0, HP["total_items"] + 1, dtype=jnp.int32)
    x_lens = jnp.array([S, 5], dtype=jnp.int32)
    # std_z ~ N(0,1) in sample_latent — deterministic here via PRNGKey
    noise = jax.random.normal(k_noise, (B * S, HP["latent_size"]),
                              dtype=jnp.float32)

    dec_out, z_mean, z_log_sigma = model_sld_forward(prep, x, x_lens, noise)
    jax.block_until_ready((dec_out, z_mean, z_log_sigma))

    assert dec_out.shape == (B, S, HP["total_items"])
    assert z_mean.shape == (B * S, HP["latent_size"])
    assert z_log_sigma.shape == (B * S, HP["latent_size"])
    assert bool(jnp.all(jnp.isfinite(dec_out)))
    assert bool(jnp.all(jnp.isfinite(z_mean)))
    assert bool(jnp.all(jnp.isfinite(z_log_sigma)))
    print("KERNEL_OK")
</pallas_src>

<mosaic_0001>
module attributes {stable_mosaic.version = 11 : i64} {
  func.func @kernel(%arg0: memref<16x1xi32, #tpu.memory_space<vmem>>, %arg1: memref<16x1xf32, #tpu.memory_space<vmem>>, %arg2: memref<16x8xf32, #tpu.memory_space<vmem>>, %arg3: memref<25x16xf32, #tpu.memory_space<vmem>>, %arg4: memref<16x96xf32, #tpu.memory_space<vmem>>, %arg5: memref<32x96xf32, #tpu.memory_space<vmem>>, %arg6: memref<1x96xf32, #tpu.memory_space<vmem>>, %arg7: memref<1x32xf32, #tpu.memory_space<vmem>>, %arg8: memref<32x32xf32, #tpu.memory_space<vmem>>, %arg9: memref<1x32xf32, #tpu.memory_space<vmem>>, %arg10: memref<32x16xf32, #tpu.memory_space<vmem>>, %arg11: memref<1x16xf32, #tpu.memory_space<vmem>>, %arg12: memref<8x32xf32, #tpu.memory_space<vmem>>, %arg13: memref<1x32xf32, #tpu.memory_space<vmem>>, %arg14: memref<32x128xf32, #tpu.memory_space<vmem>>, %arg15: memref<1x128xf32, #tpu.memory_space<vmem>>, %arg16: memref<16x128xf32, #tpu.memory_space<vmem>>, %arg17: memref<16x16xf32, #tpu.memory_space<vmem>>) attributes {dimension_semantics = [], scalar_prefetch = 0 : i64, scratch_operands = 0 : i64, tpu.core_type = #tpu.core_type<tc>} {
    %c0 = arith.constant 0 : index
    %c0_0 = arith.constant 0 : index
    %0 = vector.load %arg0[%c0, %c0_0] : memref<16x1xi32, #tpu.memory_space<vmem>>, vector<16x1xi32>
    %1 = tpu.iota {dimensions = array<i32: 1>} : vector<16x25xi32>
    %2 = vector.broadcast %0 : vector<16x1xi32> to vector<16x25xi32>
    %3 = arith.cmpi eq, %1, %2 : vector<16x25xi32>
    %4 = arith.extui %3 : vector<16x25xi1> to vector<16x25xi32>
    %5 = arith.sitofp %4 : vector<16x25xi32> to vector<16x25xf32>
    %c0_1 = arith.constant 0 : index
    %c0_2 = arith.constant 0 : index
    %6 = vector.load %arg3[%c0_1, %c0_2] : memref<25x16xf32, #tpu.memory_space<vmem>>, vector<25x16xf32>
    %cst = arith.constant dense<0.000000e+00> : vector<16x16xf32>
    %7 = tpu.matmul %5, %6, %cst {dimension_numbers = #tpu.dot_dimension_numbers<[1], [0], [0], [1], [0, 0, 1, 1], [], []>} : vector<16x25xf32>, vector<25x16xf32>, vector<16x16xf32> -> vector<16x16xf32>
    %c0_3 = arith.constant 0 : index
    %c0_4 = arith.constant 0 : index
    %8 = vector.load %arg4[%c0_3, %c0_4] : memref<16x96xf32, #tpu.memory_space<vmem>>, vector<16x96xf32>
    %cst_5 = arith.constant dense<0.000000e+00> : vector<16x96xf32>
    %9 = tpu.matmul %7, %8, %cst_5 {dimension_numbers = #tpu.dot_dimension_numbers<[1], [0], [0], [1], [0, 0, 1, 1], [], []>} : vector<16x16xf32>, vector<16x96xf32>, vector<16x96xf32> -> vector<16x96xf32>
    %c0_6 = arith.constant 0 : index
    %c0_7 = arith.constant 0 : index
    %10 = vector.load %arg6[%c0_6, %c0_7] : memref<1x96xf32, #tpu.memory_space<vmem>>, vector<1x96xf32>
    %11 = vector.broadcast %10 : vector<1x96xf32> to vector<16x96xf32>
    %12 = arith.addf %9, %11 : vector<16x96xf32>
    %c0_8 = arith.constant 0 : index
    %c0_9 = arith.constant 0 : index
    %13 = vector.load %arg5[%c0_8, %c0_9] : memref<32x96xf32, #tpu.memory_space<vmem>>, vector<32x96xf32>
    %c0_10 = arith.constant 0 : index
    %c0_11 = arith.constant 0 : index
    %14 = vector.load %arg7[%c0_10, %c0_11] : memref<1x32xf32, #tpu.memory_space<vmem>>, vector<1x32xf32>
    %cst_12 = arith.constant 0.000000e+00 : f32
    %15 = vector.broadcast %cst_12 : f32 to vector<2x32xf32>
    %16 = vector.extract_strided_slice %12 {offsets = [0, 0], sizes = [2, 96], strides = [1, 1]} : vector<16x96xf32> to vector<2x96xf32>
    %cst_13 = arith.constant dense<0.000000e+00> : vector<2x96xf32>
    %17 = tpu.matmul %15, %13, %cst_13 {dimension_numbers = #tpu.dot_dimension_numbers<[1], [0], [0], [1], [0, 0, 1, 1], [], []>} : vector<2x32xf32>, vector<32x96xf32>, vector<2x96xf32> -> vector<2x96xf32>
    %18 = vector.extract_strided_slice %16 {offsets = [0, 0], sizes = [2, 64], strides = [1, 1]} : vector<2x96xf32> to vector<2x64xf32>
    %19 = vector.extract_strided_slice %17 {offsets = [0, 0], sizes = [2, 64], strides = [1, 1]} : vector<2x96xf32> to vector<2x64xf32>
    %20 = arith.addf %18, %19 : vector<2x64xf32>
    %21 = arith.negf %20 : vector<2x64xf32>
    %22 = math.exp %21 : vector<2x64xf32>
    %cst_14 = arith.constant 1.000000e+00 : f32
    %23 = vector.broadcast %cst_14 : f32 to vector<2x64xf32>
    %24 = arith.addf %23, %22 : vector<2x64xf32>
    %25 = arith.divf %23, %24 : vector<2x64xf32>
    %26 = vector.extract_strided_slice %25 {offsets = [0, 0], sizes = [2, 32], strides = [1, 1]} : vector<2x64xf32> to vector<2x32xf32>
    %27 = vector.extract_strided_slice %25 {offsets = [0, 32], sizes = [2, 32], strides = [1, 1]} : vector<2x64xf32> to vector<2x32xf32>
    %28 = vector.extract_strided_slice %16 {offsets = [0, 64], sizes = [2, 32], strides = [1, 1]} : vector<2x96xf32> to vector<2x32xf32>
    %29 = vector.extract_strided_slice %17 {offsets = [0, 64], sizes = [2, 32], strides = [1, 1]} : vector<2x96xf32> to vector<2x32xf32>
    %30 = vector.broadcast %14 : vector<1x32xf32> to vector<2x32xf32>
    %31 = arith.addf %29, %30 : vector<2x32xf32>
    %32 = arith.mulf %26, %31 : vector<2x32xf32>
    %33 = arith.addf %28, %32 : vector<2x32xf32>
    %34 = math.tanh %33 : vector<2x32xf32>
    %cst_15 = arith.constant 1.000000e+00 : f32
    %35 = vector.broadcast %cst_15 : f32 to vector<2x32xf32>
    %36 = arith.subf %35, %27 : vector<2x32xf32>
    %37 = arith.mulf %36, %34 : vector<2x32xf32>
    %38 = arith.mulf %27, %15 : vector<2x32xf32>
    %39 = arith.addf %37, %38 : vector<2x32xf32>
    %40 = vector.extract_strided_slice %12 {offsets = [2, 0], sizes = [2, 96], strides = [1, 1]} : vector<16x96xf32> to vector<2x96xf32>
    %cst_16 = arith.constant dense<0.000000e+00> : vector<2x96xf32>
    %41 = tpu.matmul %39, %13, %cst_16 {dimension_numbers = #tpu.dot_dimension_numbers<[1], [0], [0], [1], [0, 0, 1, 1], [], []>} : vector<2x32xf32>, vector<32x96xf32>, vector<2x96xf32> -> vector<2x96xf32>
    %42 = vector.extract_strided_slice %40 {offsets = [0, 0], sizes = [2, 64], strides = [1, 1]} : vector<2x96xf32> to vector<2x64xf32>
    %43 = vector.extract_strided_slice %41 {offsets = [0, 0], sizes = [2, 64], strides = [1, 1]} : vector<2x96xf32> to vector<2x64xf32>
    %44 = arith.addf %42, %43 : vector<2x64xf32>
    %45 = arith.negf %44 : vector<2x64xf32>
    %46 = math.exp %45 : vector<2x64xf32>
    %cst_17 = arith.constant 1.000000e+00 : f32
    %47 = vector.broadcast %cst_17 : f32 to vector<2x64xf32>
    %48 = arith.addf %47, %46 : vector<2x64xf32>
    %49 = arith.divf %47, %48 : vector<2x64xf32>
    %50 = vector.extract_strided_slice %49 {offsets = [0, 0], sizes = [2, 32], strides = [1, 1]} : vector<2x64xf32> to vector<2x32xf32>
    %51 = vector.extract_strided_slice %49 {offsets = [0, 32], sizes = [2, 32], strides = [1, 1]} : vector<2x64xf32> to vector<2x32xf32>
    %52 = vector.extract_strided_slice %40 {offsets = [0, 64], sizes = [2, 32], strides = [1, 1]} : vector<2x96xf32> to vector<2x32xf32>
    %53 = vector.extract_strided_slice %41 {offsets = [0, 64], sizes = [2, 32], strides = [1, 1]} : vector<2x96xf32> to vector<2x32xf32>
    %54 = vector.broadcast %14 : vector<1x32xf32> to vector<2x32xf32>
    %55 = arith.addf %53, %54 : vector<2x32xf32>
    %56 = arith.mulf %50, %55 : vector<2x32xf32>
    %57 = arith.addf %52, %56 : vector<2x32xf32>
    %58 = math.tanh %57 : vector<2x32xf32>
    %cst_18 = arith.constant 1.000000e+00 : f32
    %59 = vector.broadcast %cst_18 : f32 to vector<2x32xf32>
    %60 = arith.subf %59, %51 : vector<2x32xf32>
    %61 = arith.mulf %60, %58 : vector<2x32xf32>
    %62 = arith.mulf %51, %39 : vector<2x32xf32>
    %63 = arith.addf %61, %62 : vector<2x32xf32>
    %64 = vector.extract_strided_slice %12 {offsets = [4, 0], sizes = [2, 96], strides = [1, 1]} : vector<16x96xf32> to vector<2x96xf32>
    %cst_19 = arith.constant dense<0.000000e+00> : vector<2x96xf32>
    %65 = tpu.matmul %63, %13, %cst_19 {dimension_numbers = #tpu.dot_dimension_numbers<[1], [0], [0], [1], [0, 0, 1, 1], [], []>} : vector<2x32xf32>, vector<32x96xf32>, vector<2x96xf32> -> vector<2x96xf32>
    %66 = vector.extract_strided_slice %64 {offsets = [0, 0], sizes = [2, 64], strides = [1, 1]} : vector<2x96xf32> to vector<2x64xf32>
    %67 = vector.extract_strided_slice %65 {offsets = [0, 0], sizes = [2, 64], strides = [1, 1]} : vector<2x96xf32> to vector<2x64xf32>
    %68 = arith.addf %66, %67 : vector<2x64xf32>
    %69 = arith.negf %68 : vector<2x64xf32>
    %70 = math.exp %69 : vector<2x64xf32>
    %cst_20 = arith.constant 1.000000e+00 : f32
    %71 = vector.broadcast %cst_20 : f32 to vector<2x64xf32>
    %72 = arith.addf %71, %70 : vector<2x64xf32>
    %73 = arith.divf %71, %72 : vector<2x64xf32>
    %74 = vector.extract_strided_slice %73 {offsets = [0, 0], sizes = [2, 32], strides = [1, 1]} : vector<2x64xf32> to vector<2x32xf32>
    %75 = vector.extract_strided_slice %73 {offsets = [0, 32], sizes = [2, 32], strides = [1, 1]} : vector<2x64xf32> to vector<2x32xf32>
    %76 = vector.extract_strided_slice %64 {offsets = [0, 64], sizes = [2, 32], strides = [1, 1]} : vector<2x96xf32> to vector<2x32xf32>
    %77 = vector.extract_strided_slice %65 {offsets = [0, 64], sizes = [2, 32], strides = [1, 1]} : vector<2x96xf32> to vector<2x32xf32>
    %78 = vector.broadcast %14 : vector<1x32xf32> to vector<2x32xf32>
    %79 = arith.addf %77, %78 : vector<2x32xf32>
    %80 = arith.mulf %74, %79 : vector<2x32xf32>
    %81 = arith.addf %76, %80 : vector<2x32xf32>
    %82 = math.tanh %81 : vector<2x32xf32>
    %cst_21 = arith.constant 1.000000e+00 : f32
    %83 = vector.broadcast %cst_21 : f32 to vector<2x32xf32>
    %84 = arith.subf %83, %75 : vector<2x32xf32>
    %85 = arith.mulf %84, %82 : vector<2x32xf32>
    %86 = arith.mulf %75, %63 : vector<2x32xf32>
    %87 = arith.addf %85, %86 : vector<2x32xf32>
    %88 = vector.extract_strided_slice %12 {offsets = [6, 0], sizes = [2, 96], strides = [1, 1]} : vector<16x96xf32> to vector<2x96xf32>
    %cst_22 = arith.constant dense<0.000000e+00> : vector<2x96xf32>
    %89 = tpu.matmul %87, %13, %cst_22 {dimension_numbers = #tpu.dot_dimension_numbers<[1], [0], [0], [1], [0, 0, 1, 1], [], []>} : vector<2x32xf32>, vector<32x96xf32>, vector<2x96xf32> -> vector<2x96xf32>
    %90 = vector.extract_strided_slice %88 {offsets = [0, 0], sizes = [2, 64], strides = [1, 1]} : vector<2x96xf32> to vector<2x64xf32>
    %91 = vector.extract_strided_slice %89 {offsets = [0, 0], sizes = [2, 64], strides = [1, 1]} : vector<2x96xf32> to vector<2x64xf32>
    %92 = arith.addf %90, %91 : vector<2x64xf32>
    %93 = arith.negf %92 : vector<2x64xf32>
    %94 = math.exp %93 : vector<2x64xf32>
    %cst_23 = arith.constant 1.000000e+00 : f32
    %95 = vector.broadcast %cst_23 : f32 to vector<2x64xf32>
    %96 = arith.addf %95, %94 : vector<2x64xf32>
    %97 = arith.divf %95, %96 : vector<2x64xf32>
    %98 = vector.extract_strided_slice %97 {offsets = [0, 0], sizes = [2, 32], strides = [1, 1]} : vector<2x64xf32> to vector<2x32xf32>
    %99 = vector.extract_strided_slice %97 {offsets = [0, 32], sizes = [2, 32], strides = [1, 1]} : vector<2x64xf32> to vector<2x32xf32>
    %100 = vector.extract_strided_slice %88 {offsets = [0, 64], sizes = [2, 32], strides = [1, 1]} : vector<2x96xf32> to vector<2x32xf32>
    %101 = vector.extract_strided_slice %89 {offsets = [0, 64], sizes = [2, 32], strides = [1, 1]} : vector<2x96xf32> to vector<2x32xf32>
    %102 = vector.broadcast %14 : vector<1x32xf32> to vector<2x32xf32>
    %103 = arith.addf %101, %102 : vector<2x32xf32>
    %104 = arith.mulf %98, %103 : vector<2x32xf32>
    %105 = arith.addf %100, %104 : vector<2x32xf32>
    %106 = math.tanh %105 : vector<2x32xf32>
    %cst_24 = arith.constant 1.000000e+00 : f32
    %107 = vector.broadcast %cst_24 : f32 to vector<2x32xf32>
    %108 = arith.subf %107, %99 : vector<2x32xf32>
    %109 = arith.mulf %108, %106 : vector<2x32xf32>
    %110 = arith.mulf %99, %87 : vector<2x32xf32>
    %111 = arith.addf %109, %110 : vector<2x32xf32>
    %112 = vector.extract_strided_slice %12 {offsets = [8, 0], sizes = [2, 96], strides = [1, 1]} : vector<16x96xf32> to vector<2x96xf32>
    %cst_25 = arith.constant dense<0.000000e+00> : vector<2x96xf32>
    %113 = tpu.matmul %111, %13, %cst_25 {dimension_numbers = #tpu.dot_dimension_numbers<[1], [0], [0], [1], [0, 0, 1, 1], [], []>} : vector<2x32xf32>, vector<32x96xf32>, vector<2x96xf32> -> vector<2x96xf32>
    %114 = vector.extract_strided_slice %112 {offsets = [0, 0], sizes = [2, 64], strides = [1, 1]} : vector<2x96xf32> to vector<2x64xf32>
    %115 = vector.extract_strided_slice %113 {offsets = [0, 0], sizes = [2, 64], strides = [1, 1]} : vector<2x96xf32> to vector<2x64xf32>
    %116 = arith.addf %114, %115 : vector<2x64xf32>
    %117 = arith.negf %116 : vector<2x64xf32>
    %118 = math.exp %117 : vector<2x64xf32>
    %cst_26 = arith.constant 1.000000e+00 : f32
    %119 = vector.broadcast %cst_26 : f32 to vector<2x64xf32>
    %120 = arith.addf %119, %118 : vector<2x64xf32>
    %121 = arith.divf %119, %120 : vector<2x64xf32>
    %122 = vector.extract_strided_slice %121 {offsets = [0, 0], sizes = [2, 32], strides = [1, 1]} : vector<2x64xf32> to vector<2x32xf32>
    %123 = vector.extract_strided_slice %121 {offsets = [0, 32], sizes = [2, 32], strides = [1, 1]} : vector<2x64xf32> to vector<2x32xf32>
    %124 = vector.extract_strided_slice %112 {offsets = [0, 64], sizes = [2, 32], strides = [1, 1]} : vector<2x96xf32> to vector<2x32xf32>
    %125 = vector.extract_strided_slice %113 {offsets = [0, 64], sizes = [2, 32], strides = [1, 1]} : vector<2x96xf32> to vector<2x32xf32>
    %126 = vector.broadcast %14 : vector<1x32xf32> to vector<2x32xf32>
    %127 = arith.addf %125, %126 : vector<2x32xf32>
    %128 = arith.mulf %122, %127 : vector<2x32xf32>
    %129 = arith.addf %124, %128 : vector<2x32xf32>
    %130 = math.tanh %129 : vector<2x32xf32>
    %cst_27 = arith.constant 1.000000e+00 : f32
    %131 = vector.broadcast %cst_27 : f32 to vector<2x32xf32>
    %132 = arith.subf %131, %123 : vector<2x32xf32>
    %133 = arith.mulf %132, %130 : vector<2x32xf32>
    %134 = arith.mulf %123, %111 : vector<2x32xf32>
    %135 = arith.addf %133, %134 : vector<2x32xf32>
    %136 = vector.extract_strided_slice %12 {offsets = [10, 0], sizes = [2, 96], strides = [1, 1]} : vector<16x96xf32> to vector<2x96xf32>
    %cst_28 = arith.constant dense<0.000000e+00> : vector<2x96xf32>
    %137 = tpu.matmul %135, %13, %cst_28 {dimension_numbers = #tpu.dot_dimension_numbers<[1], [0], [0], [1], [0, 0, 1, 1], [], []>} : vector<2x32xf32>, vector<32x96xf32>, vector<2x96xf32> -> vector<2x96xf32>
    %138 = vector.extract_strided_slice %136 {offsets = [0, 0], sizes = [2, 64], strides = [1, 1]} : vector<2x96xf32> to vector<2x64xf32>
    %139 = vector.extract_strided_slice %137 {offsets = [0, 0], sizes = [2, 64], strides = [1, 1]} : vector<2x96xf32> to vector<2x64xf32>
    %140 = arith.addf %138, %139 : vector<2x64xf32>
    %141 = arith.negf %140 : vector<2x64xf32>
    %142 = math.exp %141 : vector<2x64xf32>
    %cst_29 = arith.constant 1.000000e+00 : f32
    %143 = vector.broadcast %cst_29 : f32 to vector<2x64xf32>
    %144 = arith.addf %143, %142 : vector<2x64xf32>
    %145 = arith.divf %143, %144 : vector<2x64xf32>
    %146 = vector.extract_strided_slice %145 {offsets = [0, 0], sizes = [2, 32], strides = [1, 1]} : vector<2x64xf32> to vector<2x32xf32>
    %147 = vector.extract_strided_slice %145 {offsets = [0, 32], sizes = [2, 32], strides = [1, 1]} : vector<2x64xf32> to vector<2x32xf32>
    %148 = vector.extract_strided_slice %136 {offsets = [0, 64], sizes = [2, 32], strides = [1, 1]} : vector<2x96xf32> to vector<2x32xf32>
    %149 = vector.extract_strided_slice %137 {offsets = [0, 64], sizes = [2, 32], strides = [1, 1]} : vector<2x96xf32> to vector<2x32xf32>
    %150 = vector.broadcast %14 : vector<1x32xf32> to vector<2x32xf32>
    %151 = arith.addf %149, %150 : vector<2x32xf32>
    %152 = arith.mulf %146, %151 : vector<2x32xf32>
    %153 = arith.addf %148, %152 : vector<2x32xf32>
    %154 = math.tanh %153 : vector<2x32xf32>
    %cst_30 = arith.constant 1.000000e+00 : f32
    %155 = vector.broadcast %cst_30 : f32 to vector<2x32xf32>
    %156 = arith.subf %155, %147 : vector<2x32xf32>
    %157 = arith.mulf %156, %154 : vector<2x32xf32>
    %158 = arith.mulf %147, %135 : vector<2x32xf32>
    %159 = arith.addf %157, %158 : vector<2x32xf32>
    %160 = vector.extract_strided_slice %12 {offsets = [12, 0], sizes = [2, 96], strides = [1, 1]} : vector<16x96xf32> to vector<2x96xf32>
    %cst_31 = arith.constant dense<0.000000e+00> : vector<2x96xf32>
    %161 = tpu.matmul %159, %13, %cst_31 {dimension_numbers = #tpu.dot_dimension_numbers<[1], [0], [0], [1], [0, 0, 1, 1], [], []>} : vector<2x32xf32>, vector<32x96xf32>, vector<2x96xf32> -> vector<2x96xf32>
    %162 = vector.extract_strided_slice %160 {offsets = [0, 0], sizes = [2, 64], strides = [1, 1]} : vector<2x96xf32> to vector<2x64xf32>
    %163 = vector.extract_strided_slice %161 {offsets = [0, 0], sizes = [2, 64], strides = [1, 1]} : vector<2x96xf32> to vector<2x64xf32>
    %164 = arith.addf %162, %163 : vector<2x64xf32>
    %165 = arith.negf %164 : vector<2x64xf32>
    %166 = math.exp %165 : vector<2x64xf32>
    %cst_32 = arith.constant 1.000000e+00 : f32
    %167 = vector.broadcast %cst_32 : f32 to vector<2x64xf32>
    %168 = arith.addf %167, %166 : vector<2x64xf32>
    %169 = arith.divf %167, %168 : vector<2x64xf32>
    %170 = vector.extract_strided_slice %169 {offsets = [0, 0], sizes = [2, 32], strides = [1, 1]} : vector<2x64xf32> to vector<2x32xf32>
    %171 = vector.extract_strided_slice %169 {offsets = [0, 32], sizes = [2, 32], strides = [1, 1]} : vector<2x64xf32> to vector<2x32xf32>
    %172 = vector.extract_strided_slice %160 {offsets = [0, 64], sizes = [2, 32], strides = [1, 1]} : vector<2x96xf32> to vector<2x32xf32>
    %173 = vector.extract_strided_slice %161 {offsets = [0, 64], sizes = [2, 32], strides = [1, 1]} : vector<2x96xf32> to vector<2x32xf32>
    %174 = vector.broadcast %14 : vector<1x32xf32> to vector<2x32xf32>
    %175 = arith.addf %173, %174 : vector<2x32xf32>
    %176 = arith.mulf %170, %175 : vector<2x32xf32>
    %177 = arith.addf %172, %176 : vector<2x32xf32>
    %178 = math.tanh %177 : vector<2x32xf32>
    %cst_33 = arith.constant 1.000000e+00 : f32
    %179 = vector.broadcast %cst_33 : f32 to vector<2x32xf32>
    %180 = arith.subf %179, %171 : vector<2x32xf32>
    %181 = arith.mulf %180, %178 : vector<2x32xf32>
    %182 = arith.mulf %171, %159 : vector<2x32xf32>
    %183 = arith.addf %181, %182 : vector<2x32xf32>
    %184 = vector.extract_strided_slice %12 {offsets = [14, 0], sizes = [2, 96], strides = [1, 1]} : vector<16x96xf32> to vector<2x96xf32>
    %cst_34 = arith.constant dense<0.000000e+00> : vector<2x96xf32>
    %185 = tpu.matmul %183, %13, %cst_34 {dimension_numbers = #tpu.dot_dimension_numbers<[1], [0], [0], [1], [0, 0, 1, 1], [], []>} : vector<2x32xf32>, vector<32x96xf32>, vector<2x96xf32> -> vector<2x96xf32>
    %186 = vector.extract_strided_slice %184 {offsets = [0, 0], sizes = [2, 64], strides = [1, 1]} : vector<2x96xf32> to vector<2x64xf32>
    %187 = vector.extract_strided_slice %185 {offsets = [0, 0], sizes = [2, 64], strides = [1, 1]} : vector<2x96xf32> to vector<2x64xf32>
    %188 = arith.addf %186, %187 : vector<2x64xf32>
    %189 = arith.negf %188 : vector<2x64xf32>
    %190 = math.exp %189 : vector<2x64xf32>
    %cst_35 = arith.constant 1.000000e+00 : f32
    %191 = vector.broadcast %cst_35 : f32 to vector<2x64xf32>
    %192 = arith.addf %191, %190 : vector<2x64xf32>
    %193 = arith.divf %191, %192 : vector<2x64xf32>
    %194 = vector.extract_strided_slice %193 {offsets = [0, 0], sizes = [2, 32], strides = [1, 1]} : vector<2x64xf32> to vector<2x32xf32>
    %195 = vector.extract_strided_slice %193 {offsets = [0, 32], sizes = [2, 32], strides = [1, 1]} : vector<2x64xf32> to vector<2x32xf32>
    %196 = vector.extract_strided_slice %184 {offsets = [0, 64], sizes = [2, 32], strides = [1, 1]} : vector<2x96xf32> to vector<2x32xf32>
    %197 = vector.extract_strided_slice %185 {offsets = [0, 64], sizes = [2, 32], strides = [1, 1]} : vector<2x96xf32> to vector<2x32xf32>
    %198 = vector.broadcast %14 : vector<1x32xf32> to vector<2x32xf32>
    %199 = arith.addf %197, %198 : vector<2x32xf32>
    %200 = arith.mulf %194, %199 : vector<2x32xf32>
    %201 = arith.addf %196, %200 : vector<2x32xf32>
    %202 = math.tanh %201 : vector<2x32xf32>
    %cst_36 = arith.constant 1.000000e+00 : f32
    %203 = vector.broadcast %cst_36 : f32 to vector<2x32xf32>
    %204 = arith.subf %203, %195 : vector<2x32xf32>
    %205 = arith.mulf %204, %202 : vector<2x32xf32>
    %206 = arith.mulf %195, %183 : vector<2x32xf32>
    %207 = arith.addf %205, %206 : vector<2x32xf32>
    %208 = tpu.concatenate %39, %63, %87, %111, %135, %159, %183, %207 in 0 : vector<2x32xf32>, vector<2x32xf32>, vector<2x32xf32>, vector<2x32xf32>, vector<2x32xf32>, vector<2x32xf32>, vector<2x32xf32>, vector<2x32xf32> -> vector<16x32xf32>
    %c0_37 = arith.constant 0 : index
    %c0_38 = arith.constant 0 : index
    %209 = vector.load %arg1[%c0_37, %c0_38] : memref<16x1xf32, #tpu.memory_space<vmem>>, vector<16x1xf32>
    %210 = vector.broadcast %209 : vector<16x1xf32> to vector<16x32xf32>
    %211 = arith.mulf %208, %210 : vector<16x32xf32>
    %c0_39 = arith.constant 0 : index
    %c0_40 = arith.constant 0 : index
    %212 = vector.load %arg8[%c0_39, %c0_40] : memref<32x32xf32, #tpu.memory_space<vmem>>, vector<32x32xf32>
    %cst_41 = arith.constant dense<0.000000e+00> : vector<16x32xf32>
    %213 = tpu.matmul %211, %212, %cst_41 {dimension_numbers = #tpu.dot_dimension_numbers<[1], [0], [0], [1], [0, 0, 1, 1], [], []>} : vector<16x32xf32>, vector<32x32xf32>, vector<16x32xf32> -> vector<16x32xf32>
    %c0_42 = arith.constant 0 : index
    %c0_43 = arith.constant 0 : index
    %214 = vector.load %arg9[%c0_42, %c0_43] : memref<1x32xf32, #tpu.memory_space<vmem>>, vector<1x32xf32>
    %215 = vector.broadcast %214 : vector<1x32xf32> to vector<16x32xf32>
    %216 = arith.addf %213, %215 : vector<16x32xf32>
    %217 = math.tanh %216 : vector<16x32xf32>
    %c0_44 = arith.constant 0 : index
    %c0_45 = arith.constant 0 : index
    %218 = vector.load %arg10[%c0_44, %c0_45] : memref<32x16xf32, #tpu.memory_space<vmem>>, vector<32x16xf32>
    %cst_46 = arith.constant dense<0.000000e+00> : vector<16x16xf32>
    %219 = tpu.matmul %217, %218, %cst_46 {dimension_numbers = #tpu.dot_dimension_numbers<[1], [0], [0], [1], [0, 0, 1, 1], [], []>} : vector<16x32xf32>, vector<32x16xf32>, vector<16x16xf32> -> vector<16x16xf32>
    %c0_47 = arith.constant 0 : index
    %c0_48 = arith.constant 0 : index
    %220 = vector.load %arg11[%c0_47, %c0_48] : memref<1x16xf32, #tpu.memory_space<vmem>>, vector<1x16xf32>
    %221 = vector.broadcast %220 : vector<1x16xf32> to vector<16x16xf32>
    %222 = arith.addf %219, %221 : vector<16x16xf32>
    %223 = vector.extract_strided_slice %222 {offsets = [0, 0], sizes = [16, 8], strides = [1, 1]} : vector<16x16xf32> to vector<16x8xf32>
    %224 = vector.extract_strided_slice %222 {offsets = [0, 8], sizes = [16, 8], strides = [1, 1]} : vector<16x16xf32> to vector<16x8xf32>
    %225 = math.exp %224 : vector<16x8xf32>
    %c0_49 = arith.constant 0 : index
    %c0_50 = arith.constant 0 : index
    %226 = vector.load %arg2[%c0_49, %c0_50] : memref<16x8xf32, #tpu.memory_space<vmem>>, vector<16x8xf32>
    %227 = arith.mulf %225, %226 : vector<16x8xf32>
    %228 = arith.addf %223, %227 : vector<16x8xf32>
    %c0_51 = arith.constant 0 : index
    %c0_52 = arith.constant 0 : index
    %229 = vector.load %arg12[%c0_51, %c0_52] : memref<8x32xf32, #tpu.memory_space<vmem>>, vector<8x32xf32>
    %cst_53 = arith.constant dense<0.000000e+00> : vector<16x32xf32>
    %230 = tpu.matmul %228, %229, %cst_53 {dimension_numbers = #tpu.dot_dimension_numbers<[1], [0], [0], [1], [0, 0, 1, 1], [], []>} : vector<16x8xf32>, vector<8x32xf32>, vector<16x32xf32> -> vector<16x32xf32>
    %c0_54 = arith.constant 0 : index
    %c0_55 = arith.constant 0 : index
    %231 = vector.load %arg13[%c0_54, %c0_55] : memref<1x32xf32, #tpu.memory_space<vmem>>, vector<1x32xf32>
    %232 = vector.broadcast %231 : vector<1x32xf32> to vector<16x32xf32>
    %233 = arith.addf %230, %232 : vector<16x32xf32>
    %234 = math.tanh %233 : vector<16x32xf32>
    %c0_56 = arith.constant 0 : index
    %c0_57 = arith.constant 0 : index
    %235 = vector.load %arg14[%c0_56, %c0_57] : memref<32x128xf32, #tpu.memory_space<vmem>>, vector<32x128xf32>
    %cst_58 = arith.constant dense<0.000000e+00> : vector<16x128xf32>
    %236 = tpu.matmul %234, %235, %cst_58 {dimension_numbers = #tpu.dot_dimension_numbers<[1], [0], [0], [1], [0, 0, 1, 1], [], []>} : vector<16x32xf32>, vector<32x128xf32>, vector<16x128xf32> -> vector<16x128xf32>
    %c0_59 = arith.constant 0 : index
    %c0_60 = arith.constant 0 : index
    %237 = vector.load %arg15[%c0_59, %c0_60] : memref<1x128xf32, #tpu.memory_space<vmem>>, vector<1x128xf32>
    %238 = vector.broadcast %237 : vector<1x128xf32> to vector<16x128xf32>
    %239 = arith.addf %236, %238 : vector<16x128xf32>
    %c0_61 = arith.constant 0 : index
    %c0_62 = arith.constant 0 : index
    %240 = vector.load %arg16[%c0_61, %c0_62] : memref<16x128xf32, #tpu.memory_space<vmem>>, vector<16x128xf32>
    tpu.vector_store %arg16[%c0_61, %c0_62], %239 {strides = array<i32>} : memref<16x128xf32, #tpu.memory_space<vmem>>, vector<16x128xf32>,
    %c0_63 = arith.constant 0 : index
    %c0_64 = arith.constant 0 : index
    %241 = vector.load %arg17[%c0_63, %c0_64] : memref<16x16xf32, #tpu.memory_space<vmem>>, vector<16x16xf32>
    tpu.vector_store %arg17[%c0_63, %c0_64], %222 {strides = array<i32>} : memref<16x16xf32, #tpu.memory_space<vmem>>, vector<16x16xf32>,
    return
  }
}

</mosaic_0001>

<bundles_post_ra>
// kernel: model_sld_forward.1
= control target key start
LH: loop header
LB: loop body
LE: loop exit
PB: predicated region body
PF: predicated region fallthrough
CT: control target
= control target key end

     0   :  { %v1965_v0 = vmov 0   ;;  %vm82_vm0 = vcmask 1040384   ;;  %vm1966_vm1 = vmmov 1   ;;  %v57_v12 = vlaneseq  ;;  %s1970_s21 = smov 64   ;;  %s1972_s25 = smov 8   ;;  %s2336_s0 = inlined_call_operand.vmem [shape: s32[16,1], index: 0, kind: input, shape index: {}]   ;;  %s2337_s3 = inlined_call_operand.vmem [shape: f32[25,16], index: 3, kind: input, shape index: {}]   ;;  %s2338_s4 = inlined_call_operand.vmem [shape: f32[16,96], index: 4, kind: input, shape index: {}]   ;;  %s2339_s5 = inlined_call_operand.vmem [shape: f32[32,96], index: 5, kind: input, shape index: {}]   ;;  %s2340_s7 = inlined_call_operand.vmem [shape: f32[1,32], index: 7, kind: input, shape index: {}]   ;;  %s2341_s6 = inlined_call_operand.vmem [shape: f32[1,96], index: 6, kind: input, shape index: {}]   ;;  %s2342_s1 = inlined_call_operand.vmem [shape: f32[16,1], index: 1, kind: input, shape index: {}]   ;;  %s2343_s8 = inlined_call_operand.vmem [shape: f32[32,32], index: 8, kind: input, shape index: {}]   ;;  %s2344_s10 = inlined_call_operand.vmem [shape: f32[32,16], index: 10, kind: input, shape index: {}]   ;;  %s2345_s2 = inlined_call_operand.vmem [shape: f32[16,8], index: 2, kind: input, shape index: {}]   ;;  %s2346_s9 = inlined_call_operand.vmem [shape: f32[1,32], index: 9, kind: input, shape index: {}]   ;;  %s2347_s12 = inlined_call_operand.vmem [shape: f32[8,32], index: 12, kind: input, shape index: {}]   ;;  %s2348_s11 = inlined_call_operand.vmem [shape: f32[1,16], index: 11, kind: input, shape index: {}]   ;;  %s2349_s17 = inlined_call_operand.vmem [shape: f32[16,16], index: 17, kind: output, shape index: {1}]   ;;  %s2350_s14 = inlined_call_operand.vmem [shape: f32[32,128], index: 14, kind: input, shape index: {}]   ;;  %s2351_s13 = inlined_call_operand.vmem [shape: f32[1,32], index: 13, kind: input, shape index: {}]   ;;  %s2352_s15 = inlined_call_operand.vmem [shape: f32[1,128], index: 15, kind: input, shape index: {}]   ;;  %s2353_s16 = inlined_call_operand.vmem [shape: f32[16,128], index: 16, kind: output, shape index: {0}]  }
   0x1   :  { %2356 = sst [smem:[#allocation2_spill]] %s2336_s0  ;;  %1903 = vset.pattern.permute.xlu0 %v1965_v0  ;;  %1904 = vset.pattern.permute.xlu1 %v1965_v0  ;;  %vm1813_vm2 = vmpackc.low %vm82_vm0, %vm1966_vm1  ;;  %v161_v9 = vld [vmem:[%s2338_s4] sm:$0xff]  ;;  %v162_v10 = vld [vmem:[%s2338_s4 + $0x8] sm:$0xff]  ;;  %vm75_vm3 = vcmask 203776   ;;  %v1967_v15 = vmov 0.0   ;;  %v1968_v22 = vmov 0.0|0.0  }
   0x2   :  { %2357 = sst [smem:[#allocation3_spill]] %s2337_s3  ;;  %s2358_s26 = sld [smem:[#allocation2_spill]]  ;;  %v1818_v11 = vpack.c.bf16 %v162_v10, %v161_v9  ;;  %v58_v13 = vand.u32 127, %v57_v12  ;;  %v252_v19 = vld [vmem:[%s2339_s5] sm:$0xff]  ;;  %v253_v20 = vld [vmem:[%s2339_s5 + $0x8] sm:$0xff]  ;;  %v254_v23 = vld [vmem:[%s2339_s5 + $0x10] sm:$0xff] }
   0x3   :  { %s2359_s29 = sld [smem:[#allocation3_spill]]  ;;  %v2096_v21 = vpack.c.bf16 %v253_v20, %v252_v19  ;;  %v255_v24 = vld [vmem:[%s2339_s5 + $0x18] sm:$0xff]  ;;  %vm1969_vm6 = vmmov 0   ;;  %v1566_v26 = vld [vmem:[%s2340_s7] ss:$0 sm:$0xff]  ;;  %vm170_vm7 = vcmask 130048  }
   0x4   :  { %1819 = vmatprep.subr.bf16.mxu1 %v1818_v11  ;;  %v2108_v25 = vpack.c.bf16 %v255_v24, %v254_v23  ;;  %343 = vrot.lane.b32.xlu1 %v1566_v26, %s1970_s21  ;;  %v1562_v29 = vld [vmem:[%s2341_s6] ss:$0 sm:$0xff]  ;;  %s1971_s6 = smov 96   ;;  %vm257_vm8 = vcmask 261120   ;;  %vm1122_vm9 = vcmask 1041408   ;;  %vm1124_vm10 = vcmask 1043456  }
   0x5   :  { %1821 = vmatpush3.bf16.msra.mxu1 %v1818_v11  ;;  %vm1126_vm11 = vcmask 1045504   ;;  %vm1369_vm12 = vcmask 64512  }
   0x6   :  { %1822 = vmatprep.subr.bf16.mxu1 %v1968_v22 }
   0x8   :  { %v55_v1 = vld [vmem:[%s2358_s26] sm:$0xff]  ;;  %v56_v6 = vld [vmem:[%s2358_s26 + $0x8] sm:$0xff] }
   0x9   :  { %v71_v2 = vld [vmem:[%s2359_s29] sm:$0xff]  ;;  %60 = vperm.xlu0 %1903, %v55_v1   ;;  %v72_v3 = vld [vmem:[%s2359_s29 + $0x8] sm:$0xff]  ;;  %v73_v4 = vld [vmem:[%s2359_s29 + $0x10] sm:$0xff] }
   0xa   :  { %v74_v5 = vld [vmem:[%s2359_s29 + $0x18] sm:$0x1]  ;;  %v1808_v7 = vpack.c.bf16 %v72_v3, %v71_v2 }
   0xb   :  { %v1812_v8 = vpack.c.bf16 %v74_v5, %v73_v4 }
   0xc   :  { %1809 = vmatprep.subr.bf16.mxu0 %v1808_v7 }
   0xd   :  { %63 = vperm.xlu0 %1903, %v56_v6   ;;  %1811 = vmatpush3.bf16.msra.mxu0 %v1808_v7 }
   0xe   :  { %1814 = vmatprep.subr.msk.bf16.mxu0 %vm1813_vm2, %v1812_v8 }
  0x11   :  { %1817 = vmatpush3.bf16.msk.msra.mxu0 %vm1813_vm2, %v1812_v8 }
  0x12   :  { %1828 = vmatprep.subr.bf16.mxu0 %v1968_v22 }
  0x76   :  { %v2138_v33 = vpop.permute.xlu1 %343 }
  0x88   :  { %v61_v14 = vpop.permute.xlu0 %60 }
  0x89   :  { %vm65_vm4 = vcmp.eq.s32.totalorder %v58_v13, %v61_v14 }
  0x8a   :  { %v1557_v16 = vsel %vm65_vm4, 1.0, %v1967_v15 }
  0x8b   :  { %1672 = vmatprep.mubr.msk.f32.mxu0 %vm75_vm3, %v1557_v16 }
  0x8c   :  { %v64_v17 = vpop.permute.xlu0 %63 }
  0x8d   :  { %vm66_vm5 = vcmp.eq.s32.totalorder %v58_v13, %v64_v17 }
  0x8e   :  { %v1558_v18 = vsel %vm66_vm5, 1.0, %v1967_v15 }
  0x8f   :  { %1673 = vmatmul.mubr.msk.f32.vlgmr.msra.gmra.mrb[0].mxu0 %vm75_vm3, %v1558_v18 }
  0x90   :  { %1830 = vmatpush3.bf16.msra.mxu0 %v2096_v21  ;;  %1701 = vmatprep.mubr.msk.f32.mxu0 %vm1969_vm6, %v1967_v15 }
  0x91   :  { %1831 = vmatprep.subr.bf16.mxu0 %v1968_v22 }
  0x94   :  { %1833 = vmatpush3.bf16.msra.mxu0 %v2108_v25 }
  0x95   :  { %1840 = vmatprep.subr.bf16.mxu0 %v1968_v22 }
 0x162   :  { %v1674_v27 = vpop.f32.mrb[0].mxu0 }
 0x163   :  { %v152_v28 = vpop.f32.mrb[1].mxu0 }
 0x164   :  { %1679 = vmatprep.mubr.msk.f32.mxu1 %vm170_vm7, %v152_v28 }
 0x165   :  { %1680 = vmatmul.mubr.msk.f32.vlgmr.msra.gmra.mrb[0].mxu1 %vm170_vm7, %v1674_v27 }
 0x166   :  { %1824 = vmatpush3.bf16.msra.mxu1 %v2096_v21  ;;  %1690 = vmatprep.mubr.msk.f32.mxu1 %vm1969_vm6, %v1967_v15 }
 0x167   :  { %1825 = vmatprep.subr.bf16.mxu1 %v1968_v22 }
 0x16a   :  { %1827 = vmatpush3.bf16.msra.mxu1 %v2108_v25 }
 0x16b   :  { %1834 = vmatprep.subr.bf16.mxu1 %v1968_v22 }
 0x16d   :  { %1691 = vmatmul.mubr.f32.vlgmr.msra.gmra.mrb[2].mxu1 %v1967_v15 }
 0x16e   :  { %1836 = vmatpush3.bf16.msra.mxu1 %v2096_v21  ;;  %1712 = vmatprep.mubr.msk.f32.mxu1 %vm1969_vm6, %v1967_v15 }
 0x16f   :  { %1837 = vmatprep.subr.bf16.mxu1 %v1968_v22 }
 0x172   :  { %1839 = vmatpush3.bf16.msra.mxu1 %v2108_v25 }
 0x173   :  { %1846 = vmatprep.subr.bf16.mxu1 %v1968_v22 }
 0x238   :  { %v1681_v30 = vpop.f32.mrb[0].mxu1 }
 0x239   :  { %v2136_v31 = vadd.f32 %v1681_v30, %v1562_v29  ;;  %v243_v32 = vpop.f32.mrb[1].mxu1 }
 0x23a   :  { %v2142_v37 = vadd.f32 %v1562_v29, %v243_v32 }
 0x240   :  { %v327_v34 = vpop.f32.mrb[2].mxu1 }
 0x241   :  { %v346_v35 = vadd.f32 %v2138_v33, %v327_v34  ;;  %v1692_v36 = vpop.f32.mrb[3].mxu1  ;;  %v331_v38 = vadd.f32 %v327_v34, %v2142_v37 }
 0x243   :  { %348 = vrot.lane.b32.xlu1 %v346_v35, %s1970_s21  ;;  %v1565_v39 = vmul.f32 -1.442695, %v331_v38 }
 0x245   :  { %1905 = vpow2.f32 %v1565_v39 }
 0x24f   :  { %v1906_v40 = vpop.eup %1905 }
 0x250   :  { %v335_v41 = vadd.f32 1.0, %v1906_v40 }
 0x252   :  { %1907 = vrcp.f32 %v335_v41 }
 0x25c   :  { %v1908_v42 = vpop.eup %1907 }
 0x25d   :  { %v358_v48 = vsub.f32 1.0, %v1908_v42  ;;  %v364_v50 = vmul.f32 0.0, %v1908_v42 }
 0x2b5   :  { %v349_v43 = vpop.permute.xlu1 %348 }
 0x2b6   :  { %v351_v44 = vmul.f32 %v1908_v42, %v349_v43 }
 0x2b8   :  { %353 = vrot.lane.b32.xlu0 %v351_v44, %s1970_s21 }
 0x32a   :  { %v354_v45 = vpop.permute.xlu0 %353 }
 0x32b   :  { %v356_v46 = vadd.f32 %v354_v45, %v2142_v37 }
 0x32d   :  { %1909 = vtanh.f32 %v356_v46 }
 0x337   :  { %v1910_v47 = vpop.eup %1909 }
 0x338   :  { %360 = vrot.lane.b32.xlu1 %v1910_v47, %s1971_s6 }
 0x3aa   :  { %v361_v49 = vpop.permute.xlu1 %360 }
 0x3ab   :  { %v363_v51 = vmul.f32 %v361_v49, %v358_v48 }
 0x3ad   :  { %v2148_v52 = vadd.f32 %v364_v50, %v363_v51 }
 0x3af   :  { %367 = vrot.lane.b32.xlu0 %v2148_v52, %s1971_s6  ;;  %v470_v6 = vrot.slane %v2148_v52, 6 }
 0x421   :  { %v368_v53 = vpop.permute.xlu0 %367 }
 0x422   :  { %1702 = vmatmul.mubr.msk.f32.vlgmr.msra.gmra.mrb[2].mxu0 %vm257_vm8, %v368_v53 }
 0x423   :  { %1842 = vmatpush3.bf16.msra.mxu0 %v2096_v21  ;;  %1723 = vmatprep.mubr.msk.f32.mxu0 %vm1969_vm6, %v1967_v15 }
 0x424   :  { %1843 = vmatprep.subr.bf16.mxu0 %v1968_v22 }
 0x427   :  { %1845 = vmatpush3.bf16.msra.mxu0 %v2108_v25 }
 0x428   :  { %1852 = vmatprep.subr.bf16.mxu0 %v1968_v22 }
 0x4f5   :  { %v437_v54 = vpop.f32.mrb[2].mxu0 }
 0x4f6   :  { %v451_v55 = vadd.f32 %v437_v54, %v2138_v33  ;;  %v1703_v56 = vpop.f32.mrb[3].mxu0  ;;  %v442_v58 = vrot.slane %v437_v54, 6 }
 0x4f8   :  { %v453_v57 = vrot.slane %v451_v55, 6  ;;  %v444_v59 = vadd.f32 %v442_v58, %v2142_v37 }
 0x4fa   :  { %454 = vrot.lane.b32.xlu1 %v453_v57, %s1970_s21  ;;  %v1568_v60 = vmul.f32 -1.442695, %v444_v59 }
 0x4fc   :  { %1911 = vpow2.f32 %v1568_v60 }
 0x506   :  { %v1912_v61 = vpop.eup %1911 }
 0x507   :  { %v448_v62 = vadd.f32 1.0, %v1912_v61 }
 0x509   :  { %1913 = vrcp.f32 %v448_v62 }
 0x513   :  { %v1914_v63 = vpop.eup %1913 }
 0x514   :  { %v464_v5 = vsub.f32 1.0, %v1914_v63  ;;  %v472_v9 = vmul.f32 %v1914_v63, %v470_v6 }
 0x56c   :  { %v455_v0 = vpop.permute.xlu1 %454 }
 0x56d   :  { %v457_v1 = vmul.f32 %v1914_v63, %v455_v0 }
 0x56f   :  { %459 = vrot.lane.b32.xlu0 %v457_v1, %s1970_s21 }
 0x5e1   :  { %v460_v2 = vpop.permute.xlu0 %459 }
 0x5e2   :  { %v462_v3 = vadd.f32 %v460_v2, %v2142_v37 }
 0x5e4   :  { %1915 = vtanh.f32 %v462_v3 }
 0x5ee   :  { %v1916_v4 = vpop.eup %1915 }
 0x5ef   :  { %466 = vrot.lane.b32.xlu1 %v1916_v4, %s1971_s6 }
 0x661   :  { %v467_v7 = vpop.permute.xlu1 %466 }
 0x662   :  { %v469_v8 = vmul.f32 %v467_v7, %v464_v5 }
 0x664   :  { %v473_v10 = vadd.f32 %v472_v9, %v469_v8 }
 0x666   :  { %v475_v11 = vrot.slane %v473_v10, 2  ;;  %v579_v35 = vrot.slane %v473_v10, 6  ;;  %v1123_v41 = vsel %vm1122_vm9, %v2148_v52, %v473_v10 }
 0x668   :  { %476 = vrot.lane.b32.xlu0 %v475_v11, %s1971_s6 }
 0x6da   :  { %v477_v12 = vpop.permute.xlu0 %476 }
 0x6db   :  { %1713 = vmatmul.mubr.msk.f32.vlgmr.msra.gmra.mrb[4].mxu1 %vm257_vm8, %v477_v12 }
 0x6dc   :  { %1848 = vmatpush3.bf16.msra.mxu1 %v2096_v21  ;;  %1734 = vmatprep.mubr.msk.f32.mxu1 %vm1969_vm6, %v1967_v15 }
 0x6dd   :  { %1849 = vmatprep.subr.bf16.mxu1 %v1968_v22 }
 0x6e0   :  { %1851 = vmatpush3.bf16.msra.mxu1 %v2108_v25 }
 0x6e1   :  { %1858 = vmatprep.subr.bf16.mxu1 %v1968_v22 }
 0x7ae   :  { %v546_v13 = vpop.f32.mrb[4].mxu1 }
 0x7af   :  { %v560_v14 = vadd.f32 %v546_v13, %v2138_v33  ;;  %v1714_v16 = vpop.f32.mrb[5].mxu1  ;;  %v551_v18 = vrot.slane %v546_v13, 4 }
 0x7b1   :  { %v562_v17 = vrot.slane %v560_v14, 4  ;;  %v553_v19 = vadd.f32 %v551_v18, %v2142_v37 }
 0x7b3   :  { %563 = vrot.lane.b32.xlu1 %v562_v17, %s1970_s21  ;;  %v1570_v20 = vmul.f32 -1.442695, %v553_v19 }
 0x7b5   :  { %1917 = vpow2.f32 %v1570_v20 }
 0x7bf   :  { %v1918_v23 = vpop.eup %1917 }
 0x7c0   :  { %v557_v24 = vadd.f32 1.0, %v1918_v23 }
 0x7c2   :  { %1919 = vrcp.f32 %v557_v24 }
 0x7cc   :  { %v1920_v26 = vpop.eup %1919 }
 0x7cd   :  { %v573_v34 = vsub.f32 1.0, %v1920_v26  ;;  %v581_v38 = vmul.f32 %v1920_v26, %v579_v35 }
 0x825   :  { %v564_v27 = vpop.permute.xlu1 %563 }
 0x826   :  { %v566_v28 = vmul.f32 %v1920_v26, %v564_v27 }
 0x828   :  { %568 = vrot.lane.b32.xlu0 %v566_v28, %s1970_s21 }
 0x89a   :  { %v569_v29 = vpop.permute.xlu0 %568 }
 0x89b   :  { %v571_v30 = vadd.f32 %v569_v29, %v2142_v37 }
 0x89d   :  { %1921 = vtanh.f32 %v571_v30 }
 0x8a7   :  { %v1922_v32 = vpop.eup %1921 }
 0x8a8   :  { %575 = vrot.lane.b32.xlu1 %v1922_v32, %s1971_s6 }
 0x91a   :  { %v576_v36 = vpop.permute.xlu1 %575 }
 0x91b   :  { %v578_v39 = vmul.f32 %v576_v36, %v573_v34 }
 0x91d   :  { %v582_v40 = vadd.f32 %v581_v38, %v578_v39 }
 0x91f   :  { %v584_v42 = vrot.slane %v582_v40, 4  ;;  %v1125_v43 = vsel %vm1124_vm10, %v1123_v41, %v582_v40  ;;  %v688_v61 = vrot.slane %v582_v40, 6 }
 0x921   :  { %585 = vrot.lane.b32.xlu0 %v584_v42, %s1971_s6 }
 0x993   :  { %v586_v44 = vpop.permute.xlu0 %585 }
 0x994   :  { %1724 = vmatmul.mubr.msk.f32.vlgmr.msra.gmra.mrb[4].mxu0 %vm257_vm8, %v586_v44 }
 0x995   :  { %1854 = vmatpush3.bf16.msra.mxu0 %v2096_v21  ;;  %1745 = vmatprep.mubr.msk.f32.mxu0 %vm1969_vm6, %v1967_v15 }
 0x996   :  { %1855 = vmatprep.subr.bf16.mxu0 %v1968_v22 }
 0x999   :  { %1857 = vmatpush3.bf16.msra.mxu0 %v2108_v25 }
 0x99a   :  { %1864 = vmatprep.subr.bf16.mxu0 %v1968_v22 }
 0xa67   :  { %v655_v45 = vpop.f32.mrb[4].mxu0 }
 0xa68   :  { %v669_v46 = vadd.f32 %v655_v45, %v2138_v33  ;;  %v1725_v47 = vpop.f32.mrb[5].mxu0  ;;  %v660_v49 = vrot.slane %v655_v45, 2 }
 0xa6a   :  { %v671_v48 = vrot.slane %v669_v46, 2  ;;  %v662_v50 = vadd.f32 %v660_v49, %v2142_v37 }
 0xa6c   :  { %672 = vrot.lane.b32.xlu1 %v671_v48, %s1970_s21  ;;  %v1572_v51 = vmul.f32 -1.442695, %v662_v50 }
 0xa6e   :  { %1923 = vpow2.f32 %v1572_v51 }
 0xa78   :  { %v1924_v52 = vpop.eup %1923 }
 0xa79   :  { %v666_v53 = vadd.f32 1.0, %v1924_v52 }
 0xa7b   :  { %1925 = vrcp.f32 %v666_v53 }
 0xa85   :  { %v1926_v54 = vpop.eup %1925 }
 0xa86   :  { %v682_v60 = vsub.f32 1.0, %v1926_v54  ;;  %v690_v63 = vmul.f32 %v1926_v54, %v688_v61 }
 0xade   :  { %v673_v55 = vpop.permute.xlu1 %672 }
 0xadf   :  { %v675_v56 = vmul.f32 %v1926_v54, %v673_v55 }
 0xae1   :  { %677 = vrot.lane.b32.xlu0 %v675_v56, %s1970_s21 }
 0xb53   :  { %v678_v57 = vpop.permute.xlu0 %677 }
 0xb54   :  { %v680_v58 = vadd.f32 %v678_v57, %v2142_v37 }
 0xb56   :  { %1927 = vtanh.f32 %v680_v58 }
 0xb60   :  { %v1928_v59 = vpop.eup %1927 }
 0xb61   :  { %684 = vrot.lane.b32.xlu1 %v1928_v59, %s1971_s6 }
 0xbd3   :  { %v685_v62 = vpop.permute.xlu1 %684 }
 0xbd4   :  { %v687_v0 = vmul.f32 %v685_v62, %v682_v60 }
 0xbd6   :  { %v691_v1 = vadd.f32 %v690_v63, %v687_v0 }
 0xbd8   :  { %v693_v2 = vrot.slane %v691_v1, 6  ;;  %v2198_v3 = vsel %vm1126_vm11, %v1125_v43, %v691_v1 }
 0xbda   :  { %694 = vrot.lane.b32.xlu0 %v693_v2, %s1971_s6 }
 0xc4c   :  { %v695_v4 = vpop.permute.xlu0 %694 }
 0xc4d   :  { %1735 = vmatmul.mubr.msk.f32.vlgmr.msra.gmra.mrb[6].mxu1 %vm257_vm8, %v695_v4 }
 0xc4e   :  { %1860 = vmatpush3.bf16.msra.mxu1 %v2096_v21  ;;  %1756 = vmatprep.mubr.msk.f32.mxu1 %vm1969_vm6, %v1967_v15 }
 0xc4f   :  { %1861 = vmatprep.subr.bf16.mxu1 %v1968_v22 }
 0xc52   :  { %1863 = vmatpush3.bf16.msra.mxu1 %v2108_v25 }
 0xd20   :  { %v764_v37 = vpop.f32.mrb[6].mxu1 }
 0xd21   :  { %v775_v5 = vadd.f32 %v764_v37, %v2138_v33  ;;  %v1736_v6 = vpop.f32.mrb[7].mxu1  ;;  %v768_v7 = vadd.f32 %v764_v37, %v2136_v31 }
 0xd23   :  { %777 = vrot.lane.b32.xlu1 %v775_v5, %s1970_s21  ;;  %v1574_v8 = vmul.f32 -1.442695, %v768_v7 }
 0xd25   :  { %1929 = vpow2.f32 %v1574_v8 }
 0xd2f   :  { %v1930_v9 = vpop.eup %1929 }
 0xd30   :  { %v772_v10 = vadd.f32 1.0, %v1930_v9 }
 0xd32   :  { %1931 = vrcp.f32 %v772_v10 }
 0xd3c   :  { %v1932_v11 = vpop.eup %1931 }
 0xd3d   :  { %v787_v18 = vsub.f32 1.0, %v1932_v11  ;;  %v794_v20 = vmul.f32 %v1932_v11, %v693_v2 }
 0xd95   :  { %v778_v12 = vpop.permute.xlu1 %777 }
 0xd96   :  { %v780_v13 = vmul.f32 %v1932_v11, %v778_v12 }
 0xd98   :  { %782 = vrot.lane.b32.xlu0 %v780_v13, %s1970_s21 }
 0xe0a   :  { %v783_v14 = vpop.permute.xlu0 %782 }
 0xe0b   :  { %v785_v16 = vadd.f32 %v783_v14, %v2136_v31  ;;  %v1131_v14 = vld [vmem:[%s2342_s1] sm:$0xff] }
 0xe0d   :  { %1933 = vtanh.f32 %v785_v16 }
 0xe17   :  { %v1934_v17 = vpop.eup %1933 }
 0xe18   :  { %789 = vrot.lane.b32.xlu1 %v1934_v17, %s1971_s6 }
 0xe8a   :  { %v790_v19 = vpop.permute.xlu1 %789 }
 0xe8b   :  { %v792_v23 = vmul.f32 %v790_v19, %v787_v18 }
 0xe8d   :  { %v2213_v24 = vadd.f32 %v794_v20, %v792_v23 }
 0xe8f   :  { %797 = vrot.lane.b32.xlu0 %v2213_v24, %s1971_s6  ;;  %v900_v42 = vrot.slane %v2213_v24, 6 }
 0xf01   :  { %v798_v26 = vpop.permute.xlu0 %797 }
 0xf02   :  { %1746 = vmatmul.mubr.msk.f32.vlgmr.msra.gmra.mrb[6].mxu0 %vm257_vm8, %v798_v26  ;;  %v1132_v26 = vld [vmem:[%s2342_s1 + $0x8] sm:$0xff] }
 0xf03   :  { %1866 = vmatpush3.bf16.msra.mxu0 %v2096_v21  ;;  %1767 = vmatprep.mubr.msk.f32.mxu0 %vm1969_vm6, %v1967_v15 }
 0xf04   :  { %1867 = vmatprep.subr.bf16.mxu0 %v1968_v22 }
 0xf07   :  { %1869 = vmatpush3.bf16.msra.mxu0 %v2108_v25 }
 0xfd5   :  { %v867_v27 = vpop.f32.mrb[6].mxu0 }
 0xfd6   :  { %v881_v28 = vadd.f32 %v867_v27, %v2138_v33  ;;  %v1747_v29 = vpop.f32.mrb[7].mxu0  ;;  %v872_v32 = vrot.slane %v867_v27, 6 }
 0xfd8   :  { %v883_v30 = vrot.slane %v881_v28, 6  ;;  %v874_v34 = vadd.f32 %v872_v32, %v2136_v31  ;;  %v1145_v32 = vld [vmem:[%s2343_s8] sm:$0xff] }
 0xfda   :  { %884 = vrot.lane.b32.xlu1 %v883_v30, %s1970_s21  ;;  %v1576_v35 = vmul.f32 -1.442695, %v874_v34  ;;  %v1146_v34 = vld [vmem:[%s2343_s8 + $0x8] sm:$0xff] }
 0xfdc   :  { %1935 = vpow2.f32 %v1576_v35  ;;  %v1147_v35 = vld [vmem:[%s2343_s8 + $0x10] sm:$0xff] }
 0xfe6   :  { %v1936_v21 = vpop.eup %1935 }
 0xfe7   :  { %v878_v36 = vadd.f32 1.0, %v1936_v21  ;;  %v1870_v21 = vpack.c.bf16 %v1146_v34, %v1145_v32  ;;  %v1590_v32 = vld [vmem:[%s2352_s15] ss:$0 sm:$0xff] }
 0xfe9   :  { %1937 = vrcp.f32 %v878_v36  ;;  %1871 = vmatprep.subr.bf16.mxu1 %v1870_v21 }
 0xff3   :  { %v1938_v15 = vpop.eup %1937 }
 0xff4   :  { %v894_v41 = vsub.f32 1.0, %v1938_v15  ;;  %v902_v45 = vmul.f32 %v1938_v15, %v900_v42 }
0x104c   :  { %v885_v38 = vpop.permute.xlu1 %884 }
0x104d   :  { %v887_v22 = vmul.f32 %v1938_v15, %v885_v38 }
0x104f   :  { %889 = vrot.lane.b32.xlu0 %v887_v22, %s1970_s21 }
0x10c1   :  { %v890_v25 = vpop.permute.xlu0 %889 }
0x10c2   :  { %v892_v39 = vadd.f32 %v890_v25, %v2136_v31 }
0x10c4   :  { %1939 = vtanh.f32 %v892_v39 }
0x10ce   :  { %v1940_v40 = vpop.eup %1939 }
0x10cf   :  { %896 = vrot.lane.b32.xlu1 %v1940_v40, %s1971_s6 }
0x1141   :  { %v897_v43 = vpop.permute.xlu1 %896 }
0x1142   :  { %v899_v44 = vmul.f32 %v897_v43, %v894_v41 }
0x1144   :  { %v903_v46 = vadd.f32 %v902_v45, %v899_v44 }
0x1146   :  { %v905_v47 = vrot.slane %v903_v46, 2  ;;  %v1009_v1 = vrot.slane %v903_v46, 6  ;;  %v1128_v6 = vsel %vm1122_vm9, %v2213_v24, %v903_v46  ;;  %v1243_v46 = vld [vmem:[%s2344_s10] sm:$0xff] }
0x1148   :  { %906 = vrot.lane.b32.xlu0 %v905_v47, %s1971_s6  ;;  %v1244_v47 = vld [vmem:[%s2344_s10 + $0x8] sm:$0xff] }
0x11ba   :  { %v907_v48 = vpop.permute.xlu0 %906 }
0x11bb   :  { %1757 = vmatmul.mubr.msk.f32.vlgmr.msra.gmra.mrb[8].mxu1 %vm257_vm8, %v907_v48  ;;  %v1245_v48 = vld [vmem:[%s2344_s10 + $0x10] sm:$0xff] }
0x11bc   :  { %1873 = vmatpush3.bf16.msra.mxu1 %v1870_v21 }
0x128e   :  { %v976_v49 = vpop.f32.mrb[8].mxu1 }
0x128f   :  { %v990_v50 = vadd.f32 %v976_v49, %v2138_v33  ;;  %v1758_v51 = vpop.f32.mrb[9].mxu1  ;;  %v981_v53 = vrot.slane %v976_v49, 4  ;;  %v1878_v49 = vpack.c.bf16 %v1244_v47, %v1243_v46 }
0x1291   :  { %v992_v52 = vrot.slane %v990_v50, 4  ;;  %v983_v54 = vadd.f32 %v981_v53, %v2136_v31  ;;  %v1246_v50 = vld [vmem:[%s2344_s10 + $0x18] sm:$0xff]  ;;  %1879 = vmatprep.subr.bf16.mxu0 %v1878_v49  ;;  %v1339_v53 = vld [vmem:[%s2345_s2] sm:$0xff] }
0x1292   :  { %v1882_v51 = vpack.c.bf16 %v1246_v50, %v1245_v48 }
0x1293   :  { %993 = vrot.lane.b32.xlu1 %v992_v52, %s1970_s21  ;;  %v1578_v55 = vmul.f32 -1.442695, %v983_v54  ;;  %v1340_v52 = vld [vmem:[%s2345_s2 + $0x8] sm:$0xff]  ;;  %v1581_v54 = vld [vmem:[%s2346_s9] ss:$0 sm:$0xff] }
0x1295   :  { %1941 = vpow2.f32 %v1578_v55 }
0x129f   :  { %v1942_v56 = vpop.eup %1941 }
0x12a0   :  { %v987_v57 = vadd.f32 1.0, %v1942_v56 }
0x12a2   :  { %1943 = vrcp.f32 %v987_v57 }
0x12ac   :  { %v1944_v58 = vpop.eup %1943 }
0x12ad   :  { %v1003_v0 = vsub.f32 1.0, %v1944_v58  ;;  %v1011_v4 = vmul.f32 %v1944_v58, %v1009_v1 }
0x1305   :  { %v994_v59 = vpop.permute.xlu1 %993 }
0x1306   :  { %v996_v60 = vmul.f32 %v1944_v58, %v994_v59 }
0x1308   :  { %998 = vrot.lane.b32.xlu0 %v996_v60, %s1970_s21 }
0x137a   :  { %v999_v61 = vpop.permute.xlu0 %998 }
0x137b   :  { %v1001_v62 = vadd.f32 %v999_v61, %v2136_v31  ;;  %v1361_v61 = vld [vmem:[%s2347_s12] sm:$0xff] }
0x137d   :  { %1945 = vtanh.f32 %v1001_v62  ;;  %v1584_v62 = vld [vmem:[%s2348_s11] ss:$0 sm:$0xff]  ;;  %s1973_s11 = smov 120  }
0x1387   :  { %v1946_v63 = vpop.eup %1945 }
0x1388   :  { %1005 = vrot.lane.b32.xlu1 %v1946_v63, %s1971_s6 }
0x13fa   :  { %v1006_v2 = vpop.permute.xlu1 %1005 }
0x13fb   :  { %v1008_v37 = vmul.f32 %v1006_v2, %v1003_v0 }
0x13fd   :  { %v1012_v5 = vadd.f32 %v1011_v4, %v1008_v37 }
0x13ff   :  { %v1014_v7 = vrot.slane %v1012_v5, 4  ;;  %v1129_v8 = vsel %vm1124_vm10, %v1128_v6, %v1012_v5  ;;  %v1118_v25 = vrot.slane %v1012_v5, 6 }
0x1401   :  { %1015 = vrot.lane.b32.xlu0 %v1014_v7, %s1971_s6 }
0x1473   :  { %v1016_v9 = vpop.permute.xlu0 %1015 }
0x1474   :  { %1768 = vmatmul.mubr.msk.f32.vlgmr.msra.gmra.mrb[8].mxu0 %vm257_vm8, %v1016_v9 }
0x1475   :  { %1881 = vmatpush3.bf16.msra.mxu0 %v1878_v49 }
0x1476   :  { %1883 = vmatprep.subr.bf16.mxu0 %v1882_v51 }
0x1479   :  { %1885 = vmatpush3.bf16.msra.mxu0 %v1882_v51 }
0x1547   :  { %v1085_v10 = vpop.f32.mrb[8].mxu0 }
0x1548   :  { %v1099_v11 = vadd.f32 %v1085_v10, %v2138_v33  ;;  %v1769_v12 = vpop.f32.mrb[9].mxu0  ;;  %v1090_v16 = vrot.slane %v1085_v10, 2 }
0x154a   :  { %v1101_v13 = vrot.slane %v1099_v11, 2  ;;  %v1092_v17 = vadd.f32 %v1090_v16, %v2136_v31  ;;  %v1453_v16 = vld [vmem:[%s2350_s14] sm:$0xff] }
0x154c   :  { %1102 = vrot.lane.b32.xlu1 %v1101_v13, %s1970_s21  ;;  %v1580_v18 = vmul.f32 -1.442695, %v1092_v17  ;;  %v1454_v17 = vld [vmem:[%s2350_s14 + $0x8] sm:$0xff] }
0x154e   :  { %1947 = vpow2.f32 %v1580_v18  ;;  %v1455_v18 = vld [vmem:[%s2350_s14 + $0x10] sm:$0xff] }
0x1550   :  { %1135 = vperm.xlu1 %1904, %v1131_v14  }
0x1558   :  { %v1948_v19 = vpop.eup %1947 }
0x1559   :  { %v1096_v20 = vadd.f32 1.0, %v1948_v19  ;;  %v1886_v19 = vpack.c.bf16 %v1454_v17, %v1453_v16 }
0x155b   :  { %1949 = vrcp.f32 %v1096_v20  ;;  %v1456_v20 = vld [vmem:[%s2350_s14 + $0x18] sm:$0xff]  ;;  %1887 = vmatprep.subr.bf16.mxu0 %v1886_v19 }
0x1565   :  { %v1950_v23 = vpop.eup %1949 }
0x1566   :  { %v1112_v22 = vsub.f32 1.0, %v1950_v23  ;;  %v1120_v40 = vmul.f32 %v1950_v23, %v1118_v25 }
0x15be   :  { %v1103_v24 = vpop.permute.xlu1 %1102 }
0x15bf   :  { %v1105_v33 = vmul.f32 %v1950_v23, %v1103_v24  ;;  %v1890_v23 = vpack.c.bf16 %v1456_v20, %v1455_v18  ;;  %v1587_v24 = vld [vmem:[%s2351_s13] ss:$0 sm:$0xff] }
0x15c1   :  { %1107 = vrot.lane.b32.xlu0 %v1105_v33, %s1970_s21 }
0x15c5   :  { %1140 = vperm.xlu0 %1903, %v1132_v26  }
0x15cf   :  { %v1136_v27 = vpop.permute.xlu1 %1135 }
0x15d0   :  { %v1143_v28 = vmul.f32 %v1136_v27, %v2198_v3  ;;  %v1148_v3 = vld [vmem:[%s2343_s8 + $0x18] sm:$0xff] }
0x15d1   :  { %v1874_v36 = vpack.c.bf16 %v1148_v3, %v1147_v35 }
0x15d2   :  { %1158 = vrot.lane.b32.xlu0 %v1143_v28, %s1971_s6 }
0x15d3   :  { %1875 = vmatprep.subr.bf16.mxu1 %v1874_v36 }
0x15d4   :  { %1877 = vmatpush3.bf16.msra.mxu1 %v1874_v36 }
0x15d5   :  { %1792 = vmatprep.subr.mxu1 %v1361_v61 }
0x15d6   :  { %1343 = vrot.lane.b32.xlu0 %v1339_v53, %s1972_s25 }
0x1633   :  { %v1108_v29 = vpop.permute.xlu0 %1107 }
0x1634   :  { %v1110_v30 = vadd.f32 %v1108_v29, %v2136_v31 }
0x1636   :  { %1951 = vtanh.f32 %v1110_v30 }
0x1640   :  { %v1952_v31 = vpop.eup %1951 }
0x1641   :  { %1114 = vrot.lane.b32.xlu1 %v1952_v31, %s1971_s6 }
0x1644   :  { %v1141_v15 = vpop.permute.xlu0 %1140 }
0x1648   :  { %v1159_v38 = vpop.permute.xlu0 %1158 }
0x1649   :  { %1778 = vmatprep.mubr.msk.f32.mxu1 %vm257_vm8, %v1159_v38 }
0x164c   :  { %v1344_v6 = vpop.permute.xlu0 %1343 }
0x16b3   :  { %v1115_v39 = vpop.permute.xlu1 %1114 }
0x16b4   :  { %v1117_v41 = vmul.f32 %v1115_v39, %v1112_v22 }
0x16b6   :  { %v1121_v42 = vadd.f32 %v1120_v40, %v1117_v41 }
0x16b8   :  { %v1130_v43 = vsel %vm1126_vm11, %v1129_v8, %v1121_v42 }
0x16b9   :  { %v1144_v44 = vmul.f32 %v1141_v15, %v1130_v43 }
0x16bb   :  { %1160 = vrot.lane.b32.xlu1 %v1144_v44, %s1971_s6 }
0x16bf   :  { %1345 = vrot.lane.b32.xlu1 %v1340_v52, %s1972_s25 }
0x172d   :  { %v1161_v45 = vpop.permute.xlu1 %1160 }
0x172e   :  { %1779 = vmatmul.mubr.msk.f32.vlgmr.msra.gmra.mrb[10].mxu1 %vm257_vm8, %v1161_v45 }
0x172f   :  { %1793 = vmatpush3.msra.mxu1 %v1361_v61 }
0x1731   :  { %v1346_v5 = vpop.permute.xlu1 %1345 }
0x1801   :  { %v1780_v55 = vpop.f32.mrb[10].mxu1 }
0x1802   :  { %v1238_v56 = vadd.f32 %v1780_v55, %v1581_v54  ;;  %v1232_v57 = vpop.f32.mrb[11].mxu1 }
0x1803   :  { %v1233_v58 = vadd.f32 %v1581_v54, %v1232_v57 }
0x1805   :  { %1953 = vtanh.f32 %v1233_v58 }
0x1806   :  { %1955 = vtanh.f32 %v1238_v56 }
0x180f   :  { %v1954_v59 = vpop.eup %1953 }
0x1810   :  { %v1956_v60 = vpop.eup %1955  ;;  %1789 = vmatprep.mubr.msk.f32.mxu0 %vm257_vm8, %v1954_v59 }
0x1811   :  { %1790 = vmatmul.mubr.msk.f32.vlgmr.msra.gmra.mrb[10].mxu0 %vm257_vm8, %v1956_v60 }
0x1812   :  { %1889 = vmatpush3.bf16.msra.mxu0 %v1886_v19 }
0x1813   :  { %1891 = vmatprep.subr.bf16.mxu0 %v1890_v23 }
0x1816   :  { %1893 = vmatpush3.bf16.msra.mxu0 %v1890_v23 }
0x18e4   :  { %v1791_v63 = vpop.f32.mrb[10].mxu0 }
0x18e5   :  { %v1332_v0 = vadd.f32 %v1791_v63, %v1584_v62  ;;  %v1326_v1 = vpop.f32.mrb[11].mxu0 }
0x18e6   :  { %v1327_v2 = vadd.f32 %v1584_v62, %v1326_v1 }
0x18e7   :  { %v1337_v4 = vmul.f32 1.442695, %v1332_v0  ;;  %1548 = vst.msk [vmem:[%s2349_s17 + $0x8] sm:$0xff] %vm170_vm7, %v1332_v0 }
0x18e8   :  { %v1335_v37 = vmul.f32 1.442695, %v1327_v2  ;;  %1547 = vst.msk [vmem:[%s2349_s17] sm:$0xff] %vm170_vm7, %v1327_v2 }
0x18e9   :  { %1957 = vpow2.f32 %v1337_v4 }
0x18ea   :  { %1959 = vpow2.f32 %v1335_v37 }
0x18f3   :  { %v1958_v7 = vpop.eup %1957 }
0x18f4   :  { %v1960_v8 = vpop.eup %1959  ;;  %v1350_v9 = vmul.f32 %v1958_v7, %v1346_v5 }
0x18f5   :  { %v1349_v10 = vmul.f32 %v1960_v8, %v1344_v6 }
0x18f6   :  { %1355 = vrot.lane.b32.xlu1 %v1350_v9, %s1973_s11 }
0x18f7   :  { %1353 = vrot.lane.b32.xlu0 %v1349_v10, %s1973_s11 }
0x1968   :  { %v1356_v11 = vpop.permute.xlu1 %1355 }
0x1969   :  { %v1354_v12 = vpop.permute.xlu0 %1353  ;;  %v1360_v14 = vadd.f32 %v1356_v11, %v1332_v0 }
0x196a   :  { %v1359_v13 = vadd.f32 %v1354_v12, %v1327_v2 }
0x196c   :  { %1794 = vmatprep.mubr.msk.f32.mxu1 %vm1369_vm12, %v1359_v13 }
0x196d   :  { %1795 = vmatmul.mubr.msk.f32.vlgmr.msra.gmra.mrb[12].mxu1 %vm1369_vm12, %v1360_v14 }
0x1a40   :  { %v1796_v33 = vpop.f32.mrb[12].mxu1 }
0x1a41   :  { %v1448_v26 = vadd.f32 %v1796_v33, %v1587_v24  ;;  %v1442_v27 = vpop.f32.mrb[13].mxu1 }
0x1a42   :  { %v1443_v28 = vadd.f32 %v1587_v24, %v1442_v27 }
0x1a44   :  { %1961 = vtanh.f32 %v1443_v28 }
0x1a45   :  { %1963 = vtanh.f32 %v1448_v26 }
0x1a4e   :  { %v1962_v29 = vpop.eup %1961 }
0x1a4f   :  { %v1964_v30 = vpop.eup %1963  ;;  %1805 = vmatprep.mubr.msk.f32.mxu0 %vm257_vm8, %v1962_v29 }
0x1a50   :  { %1806 = vmatmul.mubr.msk.f32.vlgmr.msra.gmra.mrb[12].mxu0 %vm257_vm8, %v1964_v30 }
0x1b23   :  { %v1807_v34 = vpop.f32.mrb[12].mxu0 }
0x1b24   :  { %v1542_v35 = vadd.f32 %v1807_v34, %v1590_v32  ;;  %v1536_v21 = vpop.f32.mrb[13].mxu0 }
0x1b25   :  { %v1537_v3 = vadd.f32 %v1590_v32, %v1536_v21 }
0x1b26   :  { %1546 = vst [vmem:[%s2353_s16 + $0x8] sm:$0xff] %v1542_v35 }
0x1b27   :  { %1545 = vst [vmem:[%s2353_s16] sm:$0xff] %v1537_v3 }

</bundles_post_ra>
